<compile_context>
chip_gen: v7x
topology: tpu7x:2x2x1
jax: 0.10.0
libtpu: 0.0.40
codegen_flags: <defaults>
</compile_context>

<pallas_src>
import jax
import jax.numpy as jnp
from jax import lax
from jax.experimental import pallas as pl
from jax.experimental.pallas import tpu as pltpu


def deep_cbow_kernel(tok_ref, emb_ref, img_ref, w1e_ref, w1i_ref, b1_ref,
                     w2_ref, b2_ref, out_ref):
    # tok_ref : SMEM (B, seq) int32   scalar-prefetched token ids (whole batch)
    # emb_ref : VMEM (V, E)   f32     embedding table (resident across grid)
    # img_ref : VMEM (10, F)  f32     image features for this sentence
    # w1e_ref : VMEM (H, E)   f32     linear1 weight, embedding half
    # w1i_ref : VMEM (H, F)   f32     linear1 weight, image half
    # b1_ref  : VMEM (1, H)   f32
    # w2_ref  : VMEM (O, H)   f32     linear2 weight (PyTorch layout)
    # b2_ref  : VMEM (O, 1)   f32
    # out_ref : VMEM (O, 10)  f32     == h.transpose(0, 1) for this sentence
    b = pl.program_id(0)
    seq_len = tok_ref.shape[1]
    emb_dim = emb_ref.shape[1]

    # ---- Embedding gather + sum over the sequence (exact) -------------------
    # seq dynamic single-row VMEM loads + VPU adds; no MXU precision involved.
    def gather_sum(i, acc):
        return acc + emb_ref[pl.ds(tok_ref[b, i], 1), :]

    emb_sum = lax.fori_loop(0, seq_len, gather_sum,
                            jnp.zeros((1, emb_dim), jnp.float32),
                            unroll=True)                              # (1, E)

    # ---- linear1 over [repeat(emb_sum, 10) | img_feat] without the concat ---
    dnums = (((1,), (1,)), ((), ()))   # contract axis 1 of lhs with axis 1 of rhs
    h_emb = lax.dot_general(emb_sum, w1e_ref[...], dnums,
                            preferred_element_type=jnp.float32)       # (1, H)
    h_img = lax.dot_general(img_ref[...], w1i_ref[...], dnums,
                            preferred_element_type=jnp.float32)       # (10, H)
    h = jnp.tanh(h_img + h_emb + b1_ref[...])                         # (10, H)

    # ---- linear2, emitted directly transposed: W2 @ h^T ---------------------
    out = lax.dot_general(w2_ref[...], h, dnums,
                          preferred_element_type=jnp.float32)         # (O, 10)
    out_ref[...] = (out + b2_ref[...]).astype(out_ref.dtype)


@jax.jit
def deep_cbow_forward(tokens, img_feat, params):
    """Batched DeepCBOW forward.

    tokens   : (B, seq) int      token ids, one sentence per row
    img_feat : (B, 10, F) f32    image features per sentence
    returns  : (B, O, 10) f32    per-sentence h.transpose(0, 1)
    """
    emb_table = params["emb"]             # (V, E)
    w1, b1 = params["w1"], params["b1"]   # (H, E+F), (H,)
    w2, b2 = params["w2"], params["b2"]   # (O, H),   (O,)

    B, _seq = tokens.shape
    _, num_img, feat_dim = img_feat.shape
    vocab, emb_dim = emb_table.shape
    out_dim, hidden = w2.shape

    tok = tokens.astype(jnp.int32)
    # One-time static slices in the wrapper (avoids an unaligned lane slice in
    # the kernel).
    w1e = w1[:, :emb_dim]                 # (H, E)
    w1i = w1[:, emb_dim:]                 # (H, F)
    b1r = b1.reshape(1, -1)               # (1, H)
    b2c = b2.reshape(-1, 1)               # (O, 1)

    const2 = lambda b, tok_ref: (0, 0)    # weight tiles: VMEM-resident across grid

    # TODO(synk): for non-toy vocab sizes keep emb_table at memory_space=pl.ANY
    # and DMA only the seq touched rows (make_async_copy per token) instead of a
    # VMEM-resident table (v7x has only 64 MiB VMEM, 32 MiB scoped default).
    grid_spec = pltpu.PrefetchScalarGridSpec(
        num_scalar_prefetch=1,            # tokens -> SMEM, visible to all steps
        grid=(B,),
        in_specs=[
            pl.BlockSpec((vocab, emb_dim), const2),                        # emb
            pl.BlockSpec((None, num_img, feat_dim),
                         lambda b, tok_ref: (b, 0, 0)),                    # img
            pl.BlockSpec((hidden, emb_dim), const2),                       # w1e
            pl.BlockSpec((hidden, feat_dim), const2),                      # w1i
            pl.BlockSpec((1, hidden), const2),                             # b1
            pl.BlockSpec((out_dim, hidden), const2),                       # w2
            pl.BlockSpec((out_dim, 1), const2),                            # b2
        ],
        out_specs=pl.BlockSpec((None, out_dim, num_img),
                               lambda b, tok_ref: (b, 0, 0)),
    )

    flops_per_sentence = 2 * (emb_dim * hidden
                              + num_img * feat_dim * hidden
                              + num_img * hidden * out_dim)
    bytes_accessed = 4 * (tok.size + emb_table.size + img_feat.size
                          + w1.size + b1.size + w2.size + b2.size
                          + B * out_dim * num_img)

    out = pl.pallas_call(
        deep_cbow_kernel,
        out_shape=jax.ShapeDtypeStruct((B, out_dim, num_img), jnp.float32),
        grid_spec=grid_spec,
        compiler_params=pltpu.CompilerParams(
            dimension_semantics=("parallel",)),     # 2 TCs on v7x; no-op elsewhere
        cost_estimate=pl.CostEstimate(
            flops=B * flops_per_sentence,
            transcendentals=B * num_img * hidden,
            bytes_accessed=bytes_accessed),
    )(tok, emb_table, img_feat, w1e, w1i, b1r, w2, b2c)

    return out                                      # (B, output_dim, 10)


def reference_forward(tokens, img_feat, params):
    """Pure-JAX reference: the PyTorch forward applied per sentence."""
    emb_table = params["emb"]
    w1, b1, w2, b2 = params["w1"], params["b1"], params["w2"], params["b2"]

    def one(tok, img):
        embeds = emb_table[tok]                          # (seq, E)
        embeds = jnp.sum(embeds, axis=0, keepdims=True)  # (1, E)
        embeds = jnp.tile(embeds, (img.shape[0], 1))     # (10, E)
        emb_feat = jnp.concatenate([embeds, img], axis=1)
        h = jnp.tanh(emb_feat @ w1.T + b1)
        h = h @ w2.T + b2
        return h.T                                       # (O, 10)

    return jax.vmap(one)(tokens, img_feat)               # (B, O, 10)


if __name__ == "__main__":
    # Small, deterministic config.
    vocab_size = 50
    embedding_dim = 32
    img_feat_dim = 64
    hidden_dim = 32
    output_dim = 4
    seq_len = 8
    num_img = 10      # forward hard-codes repeat(10, 1)
    batch = 16        # sentences amortizing one pallas_call

    key = jax.random.PRNGKey(0)
    k_emb, k_w1, k_b1, k_w2, k_b2, k_tok, k_img = jax.random.split(key, 7)

    params = {
        "emb": jax.random.normal(k_emb, (vocab_size, embedding_dim), jnp.float32),
        "w1": jax.random.uniform(k_w1, (hidden_dim, embedding_dim + img_feat_dim),
                                 jnp.float32, -0.1, 0.1),
        "b1": jax.random.uniform(k_b1, (hidden_dim,), jnp.float32, -0.1, 0.1),
        "w2": jax.random.uniform(k_w2, (output_dim, hidden_dim),
                                 jnp.float32, -0.1, 0.1),
        "b2": jax.random.uniform(k_b2, (output_dim,), jnp.float32, -0.1, 0.1),
    }

    tokens = jax.random.randint(k_tok, (batch, seq_len), 0, vocab_size, jnp.int32)
    img_feat = jax.random.normal(k_img, (batch, num_img, img_feat_dim), jnp.float32)

    out = deep_cbow_forward(tokens, img_feat, params)
    out = jax.block_until_ready(out)

    ref = reference_forward(tokens, img_feat, params)
    assert out.shape == (batch, output_dim, num_img), out.shape
    assert jnp.allclose(out, ref, atol=1e-4, rtol=1e-4), "mismatch vs reference"

    print("KERNEL_OK")
</pallas_src>

<mosaic_0001>
module attributes {stable_mosaic.version = 11 : i64} {
  func.func @deep_cbow_kernel(%arg0: i32, %arg1: memref<16x8xi32, #tpu.memory_space<smem>>, %arg2: memref<50x32xf32, #tpu.memory_space<vmem>>, %arg3: memref<1x10x64xf32, #tpu.memory_space<vmem>>, %arg4: memref<32x32xf32, #tpu.memory_space<vmem>>, %arg5: memref<32x64xf32, #tpu.memory_space<vmem>>, %arg6: memref<1x32xf32, #tpu.memory_space<vmem>>, %arg7: memref<4x32xf32, #tpu.memory_space<vmem>>, %arg8: memref<4x1xf32, #tpu.memory_space<vmem>>, %arg9: memref<1x4x10xf32, #tpu.memory_space<vmem>>) attributes {dimension_semantics = [#tpu.dimension_semantics<parallel>], iteration_bounds = array<i64: 16>, scalar_prefetch = 1 : i64, scratch_operands = 0 : i64, tpu.core_type = #tpu.core_type<tc>, window_params = [{pipeline_mode = #tpu.pipeline_mode<synchronous>, transform_indices = @transform_0, window_bounds = array<i64: 50, 32>}, {transform_indices = @transform_1, window_bounds = array<i64: 1, 10, 64>}, {pipeline_mode = #tpu.pipeline_mode<synchronous>, transform_indices = @transform_2, window_bounds = array<i64: 32, 32>}, {pipeline_mode = #tpu.pipeline_mode<synchronous>, transform_indices = @transform_3, window_bounds = array<i64: 32, 64>}, {pipeline_mode = #tpu.pipeline_mode<synchronous>, transform_indices = @transform_4, window_bounds = array<i64: 1, 32>}, {pipeline_mode = #tpu.pipeline_mode<synchronous>, transform_indices = @transform_5, window_bounds = array<i64: 4, 32>}, {pipeline_mode = #tpu.pipeline_mode<synchronous>, transform_indices = @transform_6, window_bounds = array<i64: 4, 1>}, {transform_indices = @transform_7, window_bounds = array<i64: 1, 4, 10>}]} {
    %cst = arith.constant 0.000000e+00 : f32
    %0 = vector.broadcast %cst : f32 to vector<1x32xf32>
    %c0_i32 = arith.constant 0 : i32
    %1 = arith.index_cast %arg0 : i32 to index
    %2 = arith.index_cast %c0_i32 : i32 to index
    %3 = memref.load %arg1[%1, %2] : memref<16x8xi32, #tpu.memory_space<smem>>
    %4 = arith.index_cast %3 : i32 to index
    %c0 = arith.constant 0 : index
    %5 = vector.load %arg2[%4, %c0] : memref<50x32xf32, #tpu.memory_space<vmem>>, vector<1x32xf32>
    %6 = arith.addf %0, %5 : vector<1x32xf32>
    %c1_i32 = arith.constant 1 : i32
    %7 = arith.index_cast %arg0 : i32 to index
    %8 = arith.index_cast %c1_i32 : i32 to index
    %9 = memref.load %arg1[%7, %8] : memref<16x8xi32, #tpu.memory_space<smem>>
    %10 = arith.index_cast %9 : i32 to index
    %c0_0 = arith.constant 0 : index
    %11 = vector.load %arg2[%10, %c0_0] : memref<50x32xf32, #tpu.memory_space<vmem>>, vector<1x32xf32>
    %12 = arith.addf %6, %11 : vector<1x32xf32>
    %c2_i32 = arith.constant 2 : i32
    %13 = arith.index_cast %arg0 : i32 to index
    %14 = arith.index_cast %c2_i32 : i32 to index
    %15 = memref.load %arg1[%13, %14] : memref<16x8xi32, #tpu.memory_space<smem>>
    %16 = arith.index_cast %15 : i32 to index
    %c0_1 = arith.constant 0 : index
    %17 = vector.load %arg2[%16, %c0_1] : memref<50x32xf32, #tpu.memory_space<vmem>>, vector<1x32xf32>
    %18 = arith.addf %12, %17 : vector<1x32xf32>
    %c3_i32 = arith.constant 3 : i32
    %19 = arith.index_cast %arg0 : i32 to index
    %20 = arith.index_cast %c3_i32 : i32 to index
    %21 = memref.load %arg1[%19, %20] : memref<16x8xi32, #tpu.memory_space<smem>>
    %22 = arith.index_cast %21 : i32 to index
    %c0_2 = arith.constant 0 : index
    %23 = vector.load %arg2[%22, %c0_2] : memref<50x32xf32, #tpu.memory_space<vmem>>, vector<1x32xf32>
    %24 = arith.addf %18, %23 : vector<1x32xf32>
    %c4_i32 = arith.constant 4 : i32
    %25 = arith.index_cast %arg0 : i32 to index
    %26 = arith.index_cast %c4_i32 : i32 to index
    %27 = memref.load %arg1[%25, %26] : memref<16x8xi32, #tpu.memory_space<smem>>
    %28 = arith.index_cast %27 : i32 to index
    %c0_3 = arith.constant 0 : index
    %29 = vector.load %arg2[%28, %c0_3] : memref<50x32xf32, #tpu.memory_space<vmem>>, vector<1x32xf32>
    %30 = arith.addf %24, %29 : vector<1x32xf32>
    %c5_i32 = arith.constant 5 : i32
    %31 = arith.index_cast %arg0 : i32 to index
    %32 = arith.index_cast %c5_i32 : i32 to index
    %33 = memref.load %arg1[%31, %32] : memref<16x8xi32, #tpu.memory_space<smem>>
    %34 = arith.index_cast %33 : i32 to index
    %c0_4 = arith.constant 0 : index
    %35 = vector.load %arg2[%34, %c0_4] : memref<50x32xf32, #tpu.memory_space<vmem>>, vector<1x32xf32>
    %36 = arith.addf %30, %35 : vector<1x32xf32>
    %c6_i32 = arith.constant 6 : i32
    %37 = arith.index_cast %arg0 : i32 to index
    %38 = arith.index_cast %c6_i32 : i32 to index
    %39 = memref.load %arg1[%37, %38] : memref<16x8xi32, #tpu.memory_space<smem>>
    %40 = arith.index_cast %39 : i32 to index
    %c0_5 = arith.constant 0 : index
    %41 = vector.load %arg2[%40, %c0_5] : memref<50x32xf32, #tpu.memory_space<vmem>>, vector<1x32xf32>
    %42 = arith.addf %36, %41 : vector<1x32xf32>
    %c7_i32 = arith.constant 7 : i32
    %43 = arith.index_cast %arg0 : i32 to index
    %44 = arith.index_cast %c7_i32 : i32 to index
    %45 = memref.load %arg1[%43, %44] : memref<16x8xi32, #tpu.memory_space<smem>>
    %46 = arith.index_cast %45 : i32 to index
    %c0_6 = arith.constant 0 : index
    %47 = vector.load %arg2[%46, %c0_6] : memref<50x32xf32, #tpu.memory_space<vmem>>, vector<1x32xf32>
    %48 = arith.addf %42, %47 : vector<1x32xf32>
    %c8_i32 = arith.constant 8 : i32
    %c0_7 = arith.constant 0 : index
    %c0_8 = arith.constant 0 : index
    %49 = vector.load %arg4[%c0_7, %c0_8] : memref<32x32xf32, #tpu.memory_space<vmem>>, vector<32x32xf32>
    %cst_9 = arith.constant dense<0.000000e+00> : vector<1x32xf32>
    %50 = tpu.matmul %48, %49, %cst_9 {dimension_numbers = #tpu.dot_dimension_numbers<[1], [1], [0], [0], [0, 0, 1, 0], [], []>} : vector<1x32xf32>, vector<32x32xf32>, vector<1x32xf32> -> vector<1x32xf32>
    %c0_10 = arith.constant 0 : index
    %c0_11 = arith.constant 0 : index
    %c0_12 = arith.constant 0 : index
    %51 = vector.load %arg3[%c0_10, %c0_11, %c0_12] : memref<1x10x64xf32, #tpu.memory_space<vmem>>, vector<1x10x64xf32>
    %52 = vector.shape_cast %51 : vector<1x10x64xf32> to vector<10x64xf32>
    %c0_13 = arith.constant 0 : index
    %c0_14 = arith.constant 0 : index
    %53 = vector.load %arg5[%c0_13, %c0_14] : memref<32x64xf32, #tpu.memory_space<vmem>>, vector<32x64xf32>
    %cst_15 = arith.constant dense<0.000000e+00> : vector<10x32xf32>
    %54 = tpu.matmul %52, %53, %cst_15 {dimension_numbers = #tpu.dot_dimension_numbers<[1], [1], [0], [0], [0, 0, 1, 0], [], []>} : vector<10x64xf32>, vector<32x64xf32>, vector<10x32xf32> -> vector<10x32xf32>
    %55 = vector.broadcast %50 : vector<1x32xf32> to vector<10x32xf32>
    %56 = arith.addf %54, %55 : vector<10x32xf32>
    %c0_16 = arith.constant 0 : index
    %c0_17 = arith.constant 0 : index
    %57 = vector.load %arg6[%c0_16, %c0_17] : memref<1x32xf32, #tpu.memory_space<vmem>>, vector<1x32xf32>
    %58 = vector.broadcast %57 : vector<1x32xf32> to vector<10x32xf32>
    %59 = arith.addf %56, %58 : vector<10x32xf32>
    %60 = math.tanh %59 : vector<10x32xf32>
    %c0_18 = arith.constant 0 : index
    %c0_19 = arith.constant 0 : index
    %61 = vector.load %arg7[%c0_18, %c0_19] : memref<4x32xf32, #tpu.memory_space<vmem>>, vector<4x32xf32>
    %cst_20 = arith.constant dense<0.000000e+00> : vector<4x10xf32>
    %62 = tpu.matmul %61, %60, %cst_20 {dimension_numbers = #tpu.dot_dimension_numbers<[1], [1], [0], [0], [0, 0, 1, 0], [], []>} : vector<4x32xf32>, vector<10x32xf32>, vector<4x10xf32> -> vector<4x10xf32>
    %c0_21 = arith.constant 0 : index
    %c0_22 = arith.constant 0 : index
    %63 = vector.load %arg8[%c0_21, %c0_22] : memref<4x1xf32, #tpu.memory_space<vmem>>, vector<4x1xf32>
    %64 = vector.broadcast %63 : vector<4x1xf32> to vector<4x10xf32>
    %65 = arith.addf %62, %64 : vector<4x10xf32>
    %c0_23 = arith.constant 0 : index
    %c0_24 = arith.constant 0 : index
    %c0_25 = arith.constant 0 : index
    %66 = vector.load %arg9[%c0_23, %c0_24, %c0_25] : memref<1x4x10xf32, #tpu.memory_space<vmem>>, vector<1x4x10xf32>
    %67 = vector.shape_cast %66 : vector<1x4x10xf32> to vector<4x10xf32>
    %68 = vector.shape_cast %65 : vector<4x10xf32> to vector<1x4x10xf32>
    tpu.vector_store %arg9[%c0_23, %c0_24, %c0_25], %68 {strides = array<i32>} : memref<1x4x10xf32, #tpu.memory_space<vmem>>, vector<1x4x10xf32>,
    return
  }
  func.func @transform_0(%arg0: i32, %arg1: memref<16x8xi32, #tpu.memory_space<smem>>) -> (i32, i32) {
    %c0_i32 = arith.constant 0 : i32
    %c0_i32_0 = arith.constant 0 : i32
    %c0_i32_1 = arith.constant 0 : i32
    return %c0_i32, %c0_i32_0 : i32, i32
  }
  func.func @transform_1(%arg0: i32, %arg1: memref<16x8xi32, #tpu.memory_space<smem>>) -> (i32, i32, i32) {
    %c0_i32 = arith.constant 0 : i32
    %c0_i32_0 = arith.constant 0 : i32
    %c0_i32_1 = arith.constant 0 : i32
    return %arg0, %c0_i32, %c0_i32_0 : i32, i32, i32
  }
  func.func @transform_2(%arg0: i32, %arg1: memref<16x8xi32, #tpu.memory_space<smem>>) -> (i32, i32) {
    %c0_i32 = arith.constant 0 : i32
    %c0_i32_0 = arith.constant 0 : i32
    %c0_i32_1 = arith.constant 0 : i32
    return %c0_i32, %c0_i32_0 : i32, i32
  }
  func.func @transform_3(%arg0: i32, %arg1: memref<16x8xi32, #tpu.memory_space<smem>>) -> (i32, i32) {
    %c0_i32 = arith.constant 0 : i32
    %c0_i32_0 = arith.constant 0 : i32
    %c0_i32_1 = arith.constant 0 : i32
    return %c0_i32, %c0_i32_0 : i32, i32
  }
  func.func @transform_4(%arg0: i32, %arg1: memref<16x8xi32, #tpu.memory_space<smem>>) -> (i32, i32) {
    %c0_i32 = arith.constant 0 : i32
    %c0_i32_0 = arith.constant 0 : i32
    %c0_i32_1 = arith.constant 0 : i32
    return %c0_i32, %c0_i32_0 : i32, i32
  }
  func.func @transform_5(%arg0: i32, %arg1: memref<16x8xi32, #tpu.memory_space<smem>>) -> (i32, i32) {
    %c0_i32 = arith.constant 0 : i32
    %c0_i32_0 = arith.constant 0 : i32
    %c0_i32_1 = arith.constant 0 : i32
    return %c0_i32, %c0_i32_0 : i32, i32
  }
  func.func @transform_6(%arg0: i32, %arg1: memref<16x8xi32, #tpu.memory_space<smem>>) -> (i32, i32) {
    %c0_i32 = arith.constant 0 : i32
    %c0_i32_0 = arith.constant 0 : i32
    %c0_i32_1 = arith.constant 0 : i32
    return %c0_i32, %c0_i32_0 : i32, i32
  }
  func.func @transform_7(%arg0: i32, %arg1: memref<16x8xi32, #tpu.memory_space<smem>>) -> (i32, i32, i32) {
    %c0_i32 = arith.constant 0 : i32
    %c0_i32_0 = arith.constant 0 : i32
    %c0_i32_1 = arith.constant 0 : i32
    return %arg0, %c0_i32, %c0_i32_0 : i32, i32, i32
  }
}

</mosaic_0001>

<bundles_post_ra>
// kernel: deep_cbow_forward.1
= control target key start
LH: loop header
LB: loop body
LE: loop exit
PB: predicated region body
PF: predicated region fallthrough
CT: control target
= control target key end

     0   :  { %s985_s0 = inlined_call_operand.vmem [shape: s32[16,8], index: 0, kind: input, shape index: {}]   ;;  %s986_s1 = inlined_call_operand.vmem [shape: f32[50,32], index: 1, kind: input, shape index: {}]   ;;  %s987_s2 = inlined_call_operand.vmem [shape: f32[16,10,64], index: 2, kind: input, shape index: {}]   ;;  %s988_s3 = inlined_call_operand.vmem [shape: f32[32,32], index: 3, kind: input, shape index: {}]   ;;  %s989_s4 = inlined_call_operand.vmem [shape: f32[32,64], index: 4, kind: input, shape index: {}]   ;;  %s990_s5 = inlined_call_operand.vmem [shape: f32[1,32], index: 5, kind: input, shape index: {}]   ;;  %s991_s6 = inlined_call_operand.vmem [shape: f32[4,32], index: 6, kind: input, shape index: {}]   ;;  %s992_s7 = inlined_call_operand.vmem [shape: f32[4,1], index: 7, kind: input, shape index: {}]   ;;  %s993_s8 = inlined_call_operand.vmem [shape: f32[16,4,10], index: 8, kind: output, shape index: {}]  }
   0x1   :  { %s13_s29 = sshll.u32 %s985_s0, 4  ;;  %s14_s29 = int_to_ptr.vmem [resolvable:$true] %s13_s29 }
   0x2   :  { %s790_s30 = scalar_lea.vmem %s14_s29, 256  ;;  %p795_p1 = scmp.lt.s32.totalorder %s14_s29, %s14_s29 }
   0x3   :  { %p791_p0 = scmp.ne.s32.totalorder %s14_s29, %s790_s30  ;;  %p796_p2 = scmp.lt.s32.totalorder %s790_s30, %s790_s30 }
   0x5   :  { %p797_p3 = por %p796_p2, %p795_p1 }
   0x7   :  { %p798_p4 = pnand %p797_p3, %p791_p0 }
   0x9   :  { %801 = shalt.err (!%p798_p4)  }
   0xa   :  { %s812_s9 = smov [#allocation3]  }
   0xb   :  { %16 = dma.vmem_to_smem %s14_s29, 256, %s812_s9, [#allocation2] }
   0xc   :  { %806 = dma.done.wait [#allocation2], 256 }
   0xd   :  { %807 = vsyncadd [#allocation2], 4294967040 }
   0xe   :  { %18 = sfence }
   0xf   :  { %s865_s10 = smov 0  }
  0x10 LB: > { %s678_s0 = sadd.s32 4294967295, %s810_s10   ;;  %p682_p5 = scmp.ge.s32.totalorder %s810_s10, 1  ;;  %s810_s10 = sphi %s865_s10, %s24_s10  }
  0x11   : > { %p244_p6 = scmp.lt.s32.totalorder %s810_s10, 17 }
  0x13   : > { %p245_p7 = pnand %p682_p5, %p244_p6 }
  0x14   : > { %v416_v0 = vld [vmem:[%s989_s4] sm:$0xff] (!%p245_p7)  ;;  %v417_v1 = vld [vmem:[%s989_s4 + $0x8] sm:$0xff] (!%p245_p7)  ;;  %vm424_vm0 = vcmask (!%p245_p7), 523264   ;;  %vm328_vm1 = vcmask (!%p245_p7), 261120   ;;  %v813_v3 = vmov (!%p245_p7), 0.0|0.0   ;;  %v418_v7 = vld [vmem:[%s989_s4 + $0x10] sm:$0xff] (!%p245_p7)  ;;  %v420_v35 = vlaneseq (!%p245_p7) }
  0x15   : > { %248 = sbr.rel (%p245_p7) target bundleno = 501 (0x1f5), region = 48  ;;  %v324_v2 = vld [vmem:[%s988_s3] sm:$0xff] (!%p245_p7)  ;;  %748 = vmatprep.subr.bf16.mxu0 (!%p245_p7), %v813_v3  ;;  %v756_v4 = vpack.c.bf16 (!%p245_p7), %v417_v1, %v416_v0  ;;  %vm884_vm2 = vmpackc.low (!%p245_p7), %vm424_vm0, %vm424_vm0  ;;  %v325_v6 = vld [vmem:[%s988_s3 + $0x8] sm:$0xff] (!%p245_p7)  ;;  %p275_p8 = scmp.lt.s32.totalorder (!%p245_p7), %s678_s0, 15  ;;  %vm814_vm4 = vmmov (!%p245_p7), 0   ;;  %v815_v11 = vmov (!%p245_p7), 0.0  }
  0x16   : > { %s894_s21 = sshll.u32 (!%p245_p7), %s678_s0, 7  ;;  %v749_v8 = vpack.c.bf16 (!%p245_p7), %v325_v6, %v324_v2  ;;  %vm898_vm3 = vmpackc.low (!%p245_p7), %vm328_vm1, %vm328_vm1  ;;  %v419_v10 = vld [vmem:[%s989_s4 + $0x18] sm:$0xff] (!%p245_p7)  ;;  %727 = vmatprep.mubr.msk.f32.mxu0 (!%p245_p7), %vm814_vm4, %v815_v11  ;;  %v326_v13 = vld [vmem:[%s988_s3 + $0x10] sm:$0xff] (!%p245_p7)  ;;  %v816_v34 = vmov (!%p245_p7), 0   ;;  %v421_v37 = vshrl.u32 (!%p245_p7), %v420_v35, 7  ;;  %vm615_vm5 = vcmask (!%p245_p7), 76800  }
  0x17   : > { %s285_s24 = sld [smem:[#allocation3 + %s894_s21]] (!%p245_p7)  ;;  %s289_s25 = sadd.s32 (!%p245_p7), 1, %s894_s21  ;;  %758 = vmatprep.subr.msk.bf16.mxu1 (!%p245_p7), %vm884_vm2, %v756_v4  ;;  %v762_v12 = vpack.c.bf16 (!%p245_p7), %v419_v10, %v418_v7  ;;  %v327_v14 = vld [vmem:[%s988_s3 + $0x18] sm:$0xff] (!%p245_p7)  ;;  %v530_v33 = vld [vmem:[%s992_s7] sm:$0xf] (!%p245_p7)  ;;  %785 = vset.pattern.permute.xlu0 (!%p245_p7), %v816_v34 }
  0x18   : > { %751 = vmatpush3.bf16.xpose.msk.msra.mxu0 (!%p245_p7), %vm898_vm3, %v749_v8  ;;  %761 = vmatpush3.bf16.xpose.msk.msra.mxu1 (!%p245_p7), %vm884_vm2, %v756_v4  ;;  %s290_s26 = sld [smem:[#allocation3 + %s289_s25]] (!%p245_p7)  ;;  %s294_s27 = sadd.s32 (!%p245_p7), 2, %s894_s21  ;;  %v753_v16 = vpack.c.bf16 (!%p245_p7), %v327_v14, %v326_v13  ;;  %v422_v39 = vsub.s32 (!%p245_p7), 0, %v421_v37  ;;  %v698_v43 = vld [vmem:[%s990_s5] ss:$0 sm:$0xff] (!%p245_p7) }
  0x19   : > { %752 = vmatprep.subr.bf16.mxu0 (!%p245_p7), %v813_v3  ;;  %764 = vmatprep.subr.msk.bf16.mxu1 (!%p245_p7), %vm884_vm2, %v762_v12  ;;  %s295_s15 = sld [smem:[#allocation3 + %s294_s27]] (!%p245_p7)  ;;  %s299_s16 = sadd.s32 (!%p245_p7), 3, %s894_s21  ;;  %v529_v51 = vld [vmem:[%s991_s6] sm:$0xf] (!%p245_p7) }
  0x1a   : > { %s300_s20 = sld [smem:[#allocation3 + %s299_s16]] (!%p245_p7)  ;;  %s304_s22 = sadd.s32 (!%p245_p7), 4, %s894_s21  ;;  %533 = vperm.xlu0 (!%p245_p7), %785, %v530_v33  }
  0x1b   : > { %s309_s23 = sadd.s32 (!%p245_p7), 5, %s894_s21  ;;  %s305_s30 = sld [smem:[#allocation3 + %s304_s22]] (!%p245_p7) }
  0x1c   : > { %s999_s0 = smov (!%p275_p8, %s678_s0), 15  ;;  %s310_s27 = sld [smem:[#allocation3 + %s309_s23]] }
  0x1d   : > { %s704_s11 = sshll.u32 %s999_s0, 4  ;;  %s286_s19 = scalar_lea.vmem %s986_s1, %s285_s24 }
  0x1e   : > { %s279_s14 = scalar_lea.vmem %s987_s2, %s704_s11  ;;  %v287_v17 = vld [vmem:[%s286_s19] sm:$0x1]  ;;  %s291_s29 = scalar_lea.vmem %s986_s1, %s290_s26 }
  0x1f   : > { %v414_v15 = vld [vmem:[%s279_s14] sm:$0xff]  ;;  %s314_s9 = sadd.s32 6, %s894_s21  ;;  %s319_s11 = sadd.s32 7, %s894_s21  ;;  %v415_v23 = vld [vmem:[%s279_s14 + $0x8] sm:$0x3] }
  0x20   : > { %738 = vmatprep.mubr.msk.f32.mxu1 %vm424_vm0, %v414_v15  ;;  %v292_v18 = vld [vmem:[%s291_s29] sm:$0x1]  ;;  %755 = vmatpush3.bf16.xpose.msk.msra.mxu0 %vm898_vm3, %v753_v16  ;;  %s315_s24 = sld [smem:[#allocation3 + %s314_s9]]  ;;  %s296_s16 = scalar_lea.vmem %s986_s1, %s295_s15 }
  0x21   : > { %767 = vmatpush3.bf16.xpose.msk.msra.mxu1 %vm884_vm2, %v762_v12  ;;  %v293_v19 = vadd.f32 %v292_v18, %v287_v17  ;;  %s320_s17 = sld [smem:[#allocation3 + %s319_s11]]  ;;  %768 = vmatprep.subr.bf16.mxu0 %v813_v3  ;;  %v297_v20 = vld [vmem:[%s296_s16] sm:$0x1]  ;;  %s301_s19 = scalar_lea.vmem %s986_s1, %s300_s20 }
  0x22   : > { %v302_v22 = vld [vmem:[%s301_s19] sm:$0x1]  ;;  %s306_s25 = scalar_lea.vmem %s986_s1, %s305_s30  ;;  %s311_s15 = scalar_lea.vmem %s986_s1, %s310_s27 }
  0x23   : > { %v298_v21 = vadd.f32 %v297_v20, %v293_v19  ;;  %v307_v25 = vld [vmem:[%s306_s25] sm:$0x1]  ;;  %s685_s26 = sshll.u32 %s999_s0, 2 }
  0x24   : > { %v312_v26 = vld [vmem:[%s311_s15] sm:$0x1]  ;;  %s283_s22 = scalar_lea.vmem %s993_s8, %s685_s26 }
  0x25   : > { %v303_v24 = vadd.f32 %v302_v22, %v298_v21 }
  0x26   : > { %s316_s11 = scalar_lea.vmem %s986_s1, %s315_s24 }
  0x27   : > { %v308_v27 = vadd.f32 %v307_v25, %v303_v24  ;;  %s321_s14 = scalar_lea.vmem %s986_s1, %s320_s17  ;;  %v317_v28 = vld [vmem:[%s316_s11] sm:$0x1] }
  0x28   : > { %739 = vmatmul.mubr.msk.f32.vlgmr.msra.gmra.mrb[0].mxu1 %vm424_vm0, %v415_v23  ;;  %v322_v30 = vld [vmem:[%s321_s14] sm:$0x1] }
  0x29   : > { %v313_v29 = vadd.f32 %v312_v26, %v308_v27 }
  0x2b   : > { %v318_v31 = vadd.f32 %v317_v28, %v313_v29 }
  0x2d   : > { %v323_v32 = vadd.f32 %v322_v30, %v318_v31 }
  0x2f   : > { %728 = vmatmul.mubr.msk.f32.vlgmr.msra.gmra.mrb[0].mxu0 %vm328_vm1, %v323_v32 }
  0x30   : > { %745 = vmatprep.mubr.msk.f32.mxu0 %vm814_vm4, %v815_v11 }
  0x99   : > { %v534_v52 = vpop.permute.xlu0 %533 }
  0xfb   : > { %v740_v36 = vpop.f32.mrb[0].mxu1 }
  0xfc   : > { %v509_v38 = vpop.f32.mrb[1].mxu1 }
 0x102   : > { %v410_v40 = vpop.f32.mrb[0].mxu0 }
 0x103   : > { %v423_v41 = vrot.slane %v410_v40, %v422_v39  ;;  %v729_v42 = vpop.f32.mrb[1].mxu0 }
 0x105   : > { %v515_v44 = vadd.f32 %v740_v36, %v423_v41  ;;  %v510_v45 = vadd.f32 %v509_v38, %v423_v41 }
 0x107   : > { %v526_v46 = vadd.f32 %v698_v43, %v515_v44  ;;  %v525_v47 = vadd.f32 %v698_v43, %v510_v45 }
 0x109   : > { %786 = vtanh.f32 %v526_v46 }
 0x10a   : > { %788 = vtanh.f32 %v525_v47 }
 0x113   : > { %v787_v48 = vpop.eup %786 }
 0x114   : > { %v789_v49 = vpop.eup %788 }
 0x115   : > { %v769_v50 = vpack.c.bf16 %v787_v48, %v789_v49 }
 0x117   : > { %771 = vmatpush3.bf16.xpose.msk.msra.mxu0 %vm898_vm3, %v769_v50 }
 0x11e   : > { %746 = vmatmul.mubr.msk.f32.vlgmr.msra.gmra.mrb[2].mxu0 %vm328_vm1, %v529_v51 }
 0x1f1   : > { %v611_v53 = vpop.f32.mrb[2].mxu0 }
 0x1f2   : > { %v612_v54 = vadd.f32 %v611_v53, %v534_v52  ;;  %v747_v55 = vpop.f32.mrb[3].mxu0 }
 0x1f4   : > { %616 = vst.msk [vmem:[%s283_s22] sm:$0xf] %vm615_vm5, %v612_v54 }
 0x1f5 PF: > { %s24_s10 = sadd.s32 1, %s810_s10  }
 0x1f6   : > { %p21_p9 = scmp.ge.s32.totalorder %s24_s10, 18  }
 0x1f8   :  { %23 = sbr.rel (!%p21_p9) target bundleno = 16 (0x10), region = 86 }

</bundles_post_ra>
